<compile_context>
chip_gen: v5e
topology: v5e:2x2
jax: 0.10.0
libtpu: 0.0.40
codegen_flags: <defaults>
</compile_context>

<pallas_src>
import functools

import jax
import jax.numpy as jnp
from jax import lax
from jax.experimental import pallas as pl
from jax.experimental.pallas import tpu as pltpu

_INPUT_VMEM_BUDGET = 16 * 1024 * 1024   # bytes for double-buffered input tiles
_VMEM_LIMIT_BYTES = 48 * 1024 * 1024    # raised scoped VMEM limit (fits v7x 64 MiB)
_MAX_TILE = 2048                        # cap to bound in-kernel f32 temporaries
_NUM_CORES = 2                          # leading "parallel" axis (v7x megacore)


def _round_up(x, m):
    return (x + m - 1) // m * m


def _pick_tile(n_rows, bytes_per_row):
    """Largest row tile (multiple of 8) whose double-buffered inputs fit budget."""
    t = _INPUT_VMEM_BUDGET // (2 * max(bytes_per_row, 1))
    t = max(8, (t // 8) * 8)
    t = min(t, _MAX_TILE)
    t = min(t, _round_up(n_rows, 8))
    return t


def _noise_kernel(pred_ref, noise_ref, m_ref, sse_ref, *, n_rows, tile, s_inner):
    """Accumulates masked per-row sums of (pred - noise)^2 into sse_ref."""
    c = pl.program_id(0)
    i = pl.program_id(1)

    @pl.when(i == 0)
    def _():
        sse_ref[...] = jnp.zeros_like(sse_ref)

    d = pred_ref[...].astype(jnp.float32) - noise_ref[...].astype(jnp.float32)
    row_sse = jnp.sum(d * d, axis=-1, keepdims=True)            # (tile, 1) lane reduce
    rows = (c * s_inner + i) * tile + lax.broadcasted_iota(jnp.int32, (tile, 1), 0)
    valid = rows < n_rows                                        # ragged-tail mask
    sse_ref[...] += jnp.where(valid, row_sse * m_ref[...], 0.0)


def _learned_var_kernel(out_ref, noise_ref, cols_ref, tm_ref, tlv_ref, pm_ref,
                        plv_ref, sse_ref, kl_ref, *, n_rows, d_feat, tile, s_inner):
    """Masked SSE plus masked normal_kl (zeroed where timestep == 0)."""
    c = pl.program_id(0)
    i = pl.program_id(1)

    @pl.when(i == 0)
    def _():
        sse_ref[...] = jnp.zeros_like(sse_ref)
        kl_ref[...] = jnp.zeros_like(kl_ref)

    pred = out_ref[:, :d_feat].astype(jnp.float32)               # in-kernel [..., :D]
    noise = noise_ref[...].astype(jnp.float32)
    d = pred - noise
    row_sse = jnp.sum(d * d, axis=-1, keepdims=True)             # (tile, 1)

    tlv = tlv_ref[...].astype(jnp.float32)
    plv = plv_ref[...].astype(jnp.float32)
    dm = tm_ref[...].astype(jnp.float32) - pm_ref[...].astype(jnp.float32)
    kl = 0.5 * (-1.0 + plv - tlv + jnp.exp(tlv - plv) + dm * dm * jnp.exp(-plv))
    row_kl = jnp.sum(kl, axis=-1, keepdims=True)                 # (tile, 1)

    cols = cols_ref[...]                                         # (tile, 2)
    m = cols[:, 0:1]                                             # mask
    m_kl = cols[:, 1:2]                                          # mask * (t != 0)

    rows = (c * s_inner + i) * tile + lax.broadcasted_iota(jnp.int32, (tile, 1), 0)
    valid = rows < n_rows
    sse_ref[...] += jnp.where(valid, row_sse * m, 0.0)
    kl_ref[...] += jnp.where(valid, row_kl * m_kl, 0.0)


def mld_losses(out, learned_var=False):
    mask = out['mask']                       # (B, T)
    noise = out['noise']                     # (B, T, D)
    B, T, D = noise.shape
    N = B * T

    output = out['output']
    pred_cols = output.shape[-1]             # D, or 2D for the learned-var head
    pred2 = output.reshape(N, pred_cols)     # free reshapes, native dtype (no astype)
    noise2 = noise.reshape(N, D)
    mf = mask.astype(jnp.float32)            # tiny (B, T)

    # TODO(synk): for D not a multiple of 128, a lane-dense refold
    # (N, D) -> (N*D/128, 128) would further improve lane utilization.

    if learned_var:
        tm2 = out['true_mean'].reshape(N, D)
        tlv2 = out['true_log_var'].reshape(N, D)
        pm2 = out['pred_mean'].reshape(N, D)
        plv2 = out['pred_log_var'].reshape(N, D)
        tnz = (out['timestemps'] != 0).astype(jnp.float32)[:, None]      # (B, 1)
        cols2 = jnp.stack([mf, mf * tnz], axis=-1).reshape(N, 2)         # tiny

        bytes_per_row = (pred_cols * pred2.dtype.itemsize
                         + D * noise2.dtype.itemsize
                         + D * (tm2.dtype.itemsize + tlv2.dtype.itemsize
                                + pm2.dtype.itemsize + plv2.dtype.itemsize)
                         + 2 * 4)
        tile = _pick_tile(N, bytes_per_row)
        nblk = pl.cdiv(N, tile)
        nc = min(_NUM_CORES, nblk)
        s_inner = pl.cdiv(nblk, nc)

        def rb(c, i):
            return (jnp.minimum(c * s_inner + i, nblk - 1), 0)

        def feat(cols):
            return pl.BlockSpec((tile, cols), rb)

        out_spec = pl.BlockSpec((None, tile, 1), lambda c, i: (c, 0, 0))
        acc_shape = jax.ShapeDtypeStruct((nc, tile, 1), jnp.float32)

        kernel = functools.partial(_learned_var_kernel, n_rows=N, d_feat=D,
                                   tile=tile, s_inner=s_inner)
        sse_p, kl_p = pl.pallas_call(
            kernel,
            out_shape=(acc_shape, acc_shape),
            grid_spec=pltpu.PrefetchScalarGridSpec(
                num_scalar_prefetch=0,
                grid=(nc, s_inner),
                in_specs=[feat(pred_cols), feat(D), feat(2),
                          feat(D), feat(D), feat(D), feat(D)],
                out_specs=(out_spec, out_spec)),
            compiler_params=pltpu.CompilerParams(
                dimension_semantics=("parallel", "arbitrary"),
                vmem_limit_bytes=_VMEM_LIMIT_BYTES),
        )(pred2, noise2, cols2, tm2, tlv2, pm2, plv2)
    else:
        m2 = mf.reshape(N, 1)
        bytes_per_row = (pred_cols * pred2.dtype.itemsize
                         + D * noise2.dtype.itemsize + 4)
        tile = _pick_tile(N, bytes_per_row)
        nblk = pl.cdiv(N, tile)
        nc = min(_NUM_CORES, nblk)
        s_inner = pl.cdiv(nblk, nc)

        def rb(c, i):
            return (jnp.minimum(c * s_inner + i, nblk - 1), 0)

        out_spec = pl.BlockSpec((None, tile, 1), lambda c, i: (c, 0, 0))
        acc_shape = jax.ShapeDtypeStruct((nc, tile, 1), jnp.float32)

        kernel = functools.partial(_noise_kernel, n_rows=N, tile=tile,
                                   s_inner=s_inner)
        sse_p = pl.pallas_call(
            kernel,
            out_shape=acc_shape,
            grid_spec=pltpu.PrefetchScalarGridSpec(
                num_scalar_prefetch=0,
                grid=(nc, s_inner),
                in_specs=[pl.BlockSpec((tile, pred_cols), rb),
                          pl.BlockSpec((tile, D), rb),
                          pl.BlockSpec((tile, 1), rb)],
                out_specs=out_spec),
            compiler_params=pltpu.CompilerParams(
                dimension_semantics=("parallel", "arbitrary"),
                vmem_limit_bytes=_VMEM_LIMIT_BYTES),
        )(pred2, noise2, m2)
        kl_p = None

    denom = mf.sum() * jnp.float32(D)        # mask.sum() * x.shape[-1]
    noise_loss = sse_p.sum() / denom
    losses = {'noise': noise_loss, 'loss': noise_loss}
    if learned_var:
        vb = kl_p.sum() / denom
        losses['vb'] = vb
        losses['loss'] = noise_loss + vb * (out['num_timesteps'] / 1000.0)
    return losses


def _ref_losses(out, learned_var=False):
    """Pure-JAX reference mirroring the PyTorch module."""
    mask = out['mask']
    noise = out['noise']
    B, T, D = noise.shape
    pred = out['output'][..., :D] if learned_var else out['output']
    mf = mask.astype(jnp.float32)
    msum = mf.sum()
    noise_loss = ((pred - noise) ** 2 * mf[..., None]).sum() / (msum * D)
    losses = {'noise': noise_loss, 'loss': noise_loss}
    if learned_var:
        tlv, plv = out['true_log_var'], out['pred_log_var']
        kl = 0.5 * (-1.0 + plv - tlv + jnp.exp(tlv - plv)
                    + (out['true_mean'] - out['pred_mean']) ** 2 * jnp.exp(-plv))
        kl = kl * (out['timestemps'] != 0).astype(jnp.float32)[:, None, None]
        vb = (kl * mf[..., None]).sum() / (msum * D)
        losses['vb'] = vb
        losses['loss'] = noise_loss + vb * (out['num_timesteps'] / 1000.0)
    return losses


if __name__ == "__main__":
    # MLDLosses has no learnable parameters; only the learned_var flag.
    key = jax.random.PRNGKey(0)
    B, T, D = 2, 8, 32
    ks = jax.random.split(key, 8)

    noise = jax.random.normal(ks[0], (B, T, D), jnp.float32)
    output_lv = jax.random.normal(ks[1], (B, T, 2 * D), jnp.float32)  # learned-var head
    mask = jax.random.bernoulli(ks[2], 0.7, (B, T))
    true_mean = jax.random.normal(ks[3], (B, T, D), jnp.float32)
    true_log_var = 0.1 * jax.random.normal(ks[4], (B, T, D), jnp.float32)
    pred_mean = jax.random.normal(ks[5], (B, T, D), jnp.float32)
    pred_log_var = 0.1 * jax.random.normal(ks[6], (B, T, D), jnp.float32)
    timestemps = jnp.array([0, 5], dtype=jnp.int32)  # first batch row has t == 0

    out_lv = dict(mask=mask, output=output_lv, noise=noise,
                  true_mean=true_mean, true_log_var=true_log_var,
                  pred_mean=pred_mean, pred_log_var=pred_log_var,
                  timestemps=timestemps, num_timesteps=1000)

    res_lv = mld_losses(out_lv, learned_var=True)
    res_lv = {k: jax.block_until_ready(v) for k, v in res_lv.items()}
    ref_lv = _ref_losses(out_lv, learned_var=True)
    for k in ref_lv:
        assert jnp.allclose(res_lv[k], ref_lv[k], rtol=1e-5, atol=1e-5), (
            k, res_lv[k], ref_lv[k])

    # plain (learned_var=False) path: prediction has shape (B, T, D)
    out_plain = dict(mask=mask, output=output_lv[..., :D], noise=noise)
    res_p = mld_losses(out_plain, learned_var=False)
    res_p = {k: jax.block_until_ready(v) for k, v in res_p.items()}
    ref_p = _ref_losses(out_plain, learned_var=False)
    for k in ref_p:
        assert jnp.allclose(res_p[k], ref_p[k], rtol=1e-5, atol=1e-5), (
            k, res_p[k], ref_p[k])

    print("KERNEL_OK")
</pallas_src>

<mosaic_0001>
module attributes {stable_mosaic.version = 11 : i64} {
  func.func @_learned_var_kernel(%arg0: i32, %arg1: i32, %arg2: memref<16x64xf32, #tpu.memory_space<vmem>>, %arg3: memref<16x32xf32, #tpu.memory_space<vmem>>, %arg4: memref<16x2xf32, #tpu.memory_space<vmem>>, %arg5: memref<16x32xf32, #tpu.memory_space<vmem>>, %arg6: memref<16x32xf32, #tpu.memory_space<vmem>>, %arg7: memref<16x32xf32, #tpu.memory_space<vmem>>, %arg8: memref<16x32xf32, #tpu.memory_space<vmem>>, %arg9: memref<1x16x1xf32, #tpu.memory_space<vmem>>, %arg10: memref<1x16x1xf32, #tpu.memory_space<vmem>>) attributes {dimension_semantics = [#tpu.dimension_semantics<parallel>, #tpu.dimension_semantics<arbitrary>], iteration_bounds = array<i64: 1, 1>, scalar_prefetch = 0 : i64, scratch_operands = 0 : i64, tpu.core_type = #tpu.core_type<tc>, window_params = [{transform_indices = @transform_0, window_bounds = array<i64: 16, 64>}, {transform_indices = @transform_1, window_bounds = array<i64: 16, 32>}, {transform_indices = @transform_2, window_bounds = array<i64: 16, 2>}, {transform_indices = @transform_3, window_bounds = array<i64: 16, 32>}, {transform_indices = @transform_4, window_bounds = array<i64: 16, 32>}, {transform_indices = @transform_5, window_bounds = array<i64: 16, 32>}, {transform_indices = @transform_6, window_bounds = array<i64: 16, 32>}, {transform_indices = @transform_7, window_bounds = array<i64: 1, 16, 1>}, {transform_indices = @transform_8, window_bounds = array<i64: 1, 16, 1>}]} {
    %c0_i32 = arith.constant 0 : i32
    %0 = arith.cmpi eq, %arg1, %c0_i32 : i32
    %1 = arith.extui %0 : i1 to i32
    %c0_i32_0 = arith.constant 0 : i32
    %2 = arith.cmpi ne, %1, %c0_i32_0 : i32
    scf.if %2 {
      %cst_33 = arith.constant 0.000000e+00 : f32
      %59 = vector.broadcast %cst_33 : f32 to vector<16x1xf32>
      %c0_34 = arith.constant 0 : index
      %c0_35 = arith.constant 0 : index
      %c0_36 = arith.constant 0 : index
      %60 = vector.load %arg9[%c0_34, %c0_35, %c0_36] : memref<1x16x1xf32, #tpu.memory_space<vmem>>, vector<1x16x1xf32>
      %61 = vector.shape_cast %60 : vector<1x16x1xf32> to vector<16x1xf32>
      %62 = vector.shape_cast %59 : vector<16x1xf32> to vector<1x16x1xf32>
      tpu.vector_store %arg9[%c0_34, %c0_35, %c0_36], %62 {strides = array<i32>} : memref<1x16x1xf32, #tpu.memory_space<vmem>>, vector<1x16x1xf32>,
      %cst_37 = arith.constant 0.000000e+00 : f32
      %63 = vector.broadcast %cst_37 : f32 to vector<16x1xf32>
      %c0_38 = arith.constant 0 : index
      %c0_39 = arith.constant 0 : index
      %c0_40 = arith.constant 0 : index
      %64 = vector.load %arg10[%c0_38, %c0_39, %c0_40] : memref<1x16x1xf32, #tpu.memory_space<vmem>>, vector<1x16x1xf32>
      %65 = vector.shape_cast %64 : vector<1x16x1xf32> to vector<16x1xf32>
      %66 = vector.shape_cast %63 : vector<16x1xf32> to vector<1x16x1xf32>
      tpu.vector_store %arg10[%c0_38, %c0_39, %c0_40], %66 {strides = array<i32>} : memref<1x16x1xf32, #tpu.memory_space<vmem>>, vector<1x16x1xf32>,
    } else {
    }
    %c0 = arith.constant 0 : index
    %c0_1 = arith.constant 0 : index
    %3 = vector.load %arg2[%c0, %c0_1] : memref<16x64xf32, #tpu.memory_space<vmem>>, vector<16x32xf32>
    %c0_2 = arith.constant 0 : index
    %c0_3 = arith.constant 0 : index
    %4 = vector.load %arg3[%c0_2, %c0_3] : memref<16x32xf32, #tpu.memory_space<vmem>>, vector<16x32xf32>
    %5 = arith.subf %3, %4 : vector<16x32xf32>
    %6 = arith.mulf %5, %5 : vector<16x32xf32>
    %cst = arith.constant dense<0.000000e+00> : vector<16xf32>
    %7 = vector.multi_reduction <add>, %6, %cst [1] : vector<16x32xf32> to vector<16xf32>
    %8 = vector.shape_cast %7 : vector<16xf32> to vector<16x1xf32>
    %c0_4 = arith.constant 0 : index
    %c0_5 = arith.constant 0 : index
    %9 = vector.load %arg6[%c0_4, %c0_5] : memref<16x32xf32, #tpu.memory_space<vmem>>, vector<16x32xf32>
    %c0_6 = arith.constant 0 : index
    %c0_7 = arith.constant 0 : index
    %10 = vector.load %arg8[%c0_6, %c0_7] : memref<16x32xf32, #tpu.memory_space<vmem>>, vector<16x32xf32>
    %c0_8 = arith.constant 0 : index
    %c0_9 = arith.constant 0 : index
    %11 = vector.load %arg5[%c0_8, %c0_9] : memref<16x32xf32, #tpu.memory_space<vmem>>, vector<16x32xf32>
    %c0_10 = arith.constant 0 : index
    %c0_11 = arith.constant 0 : index
    %12 = vector.load %arg7[%c0_10, %c0_11] : memref<16x32xf32, #tpu.memory_space<vmem>>, vector<16x32xf32>
    %13 = arith.subf %11, %12 : vector<16x32xf32>
    %cst_12 = arith.constant -1.000000e+00 : f32
    %14 = vector.broadcast %cst_12 : f32 to vector<16x32xf32>
    %15 = arith.addf %14, %10 : vector<16x32xf32>
    %16 = arith.subf %15, %9 : vector<16x32xf32>
    %17 = arith.subf %9, %10 : vector<16x32xf32>
    %18 = math.exp %17 : vector<16x32xf32>
    %19 = arith.addf %16, %18 : vector<16x32xf32>
    %20 = arith.mulf %13, %13 : vector<16x32xf32>
    %cst_13 = arith.constant 0.000000e+00 : f32
    %21 = vector.broadcast %cst_13 : f32 to vector<16x32xf32>
    %22 = arith.subf %21, %10 : vector<16x32xf32>
    %23 = math.exp %22 : vector<16x32xf32>
    %24 = arith.mulf %20, %23 : vector<16x32xf32>
    %25 = arith.addf %19, %24 : vector<16x32xf32>
    %cst_14 = arith.constant 5.000000e-01 : f32
    %26 = vector.broadcast %cst_14 : f32 to vector<16x32xf32>
    %27 = arith.mulf %26, %25 : vector<16x32xf32>
    %cst_15 = arith.constant dense<0.000000e+00> : vector<16xf32>
    %28 = vector.multi_reduction <add>, %27, %cst_15 [1] : vector<16x32xf32> to vector<16xf32>
    %29 = vector.shape_cast %28 : vector<16xf32> to vector<16x1xf32>
    %c0_16 = arith.constant 0 : index
    %c0_17 = arith.constant 0 : index
    %30 = vector.load %arg4[%c0_16, %c0_17] : memref<16x2xf32, #tpu.memory_space<vmem>>, vector<16x2xf32>
    %31 = vector.extract_strided_slice %30 {offsets = [0, 0], sizes = [16, 1], strides = [1, 1]} : vector<16x2xf32> to vector<16x1xf32>
    %32 = vector.extract_strided_slice %30 {offsets = [0, 1], sizes = [16, 1], strides = [1, 1]} : vector<16x2xf32> to vector<16x1xf32>
    %c1_i32 = arith.constant 1 : i32
    %33 = arith.muli %arg0, %c1_i32 : i32
    %34 = arith.addi %33, %arg1 : i32
    %c16_i32 = arith.constant 16 : i32
    %35 = arith.muli %34, %c16_i32 : i32
    %36 = tpu.iota {dimensions = array<i32: 0>} : vector<16x1xi32>
    %37 = vector.broadcast %35 : i32 to vector<16x1xi32>
    %38 = arith.addi %37, %36 : vector<16x1xi32>
    %c16_i32_18 = arith.constant 16 : i32
    %39 = vector.broadcast %c16_i32_18 : i32 to vector<16x1xi32>
    %40 = arith.cmpi slt, %38, %39 : vector<16x1xi32>
    %c0_19 = arith.constant 0 : index
    %c0_20 = arith.constant 0 : index
    %c0_21 = arith.constant 0 : index
    %41 = vector.load %arg9[%c0_19, %c0_20, %c0_21] : memref<1x16x1xf32, #tpu.memory_space<vmem>>, vector<1x16x1xf32>
    %42 = vector.shape_cast %41 : vector<1x16x1xf32> to vector<16x1xf32>
    %43 = arith.mulf %8, %31 : vector<16x1xf32>
    %cst_22 = arith.constant 0.000000e+00 : f32
    %44 = vector.broadcast %cst_22 : f32 to vector<16x1xf32>
    %45 = arith.select %40, %43, %44 : vector<16x1xi1>, vector<16x1xf32>
    %46 = arith.addf %42, %45 : vector<16x1xf32>
    %c0_23 = arith.constant 0 : index
    %c0_24 = arith.constant 0 : index
    %c0_25 = arith.constant 0 : index
    %47 = vector.load %arg9[%c0_23, %c0_24, %c0_25] : memref<1x16x1xf32, #tpu.memory_space<vmem>>, vector<1x16x1xf32>
    %48 = vector.shape_cast %47 : vector<1x16x1xf32> to vector<16x1xf32>
    %49 = vector.shape_cast %46 : vector<16x1xf32> to vector<1x16x1xf32>
    tpu.vector_store %arg9[%c0_23, %c0_24, %c0_25], %49 {strides = array<i32>} : memref<1x16x1xf32, #tpu.memory_space<vmem>>, vector<1x16x1xf32>,
    %c0_26 = arith.constant 0 : index
    %c0_27 = arith.constant 0 : index
    %c0_28 = arith.constant 0 : index
    %50 = vector.load %arg10[%c0_26, %c0_27, %c0_28] : memref<1x16x1xf32, #tpu.memory_space<vmem>>, vector<1x16x1xf32>
    %51 = vector.shape_cast %50 : vector<1x16x1xf32> to vector<16x1xf32>
    %52 = arith.mulf %29, %32 : vector<16x1xf32>
    %cst_29 = arith.constant 0.000000e+00 : f32
    %53 = vector.broadcast %cst_29 : f32 to vector<16x1xf32>
    %54 = arith.select %40, %52, %53 : vector<16x1xi1>, vector<16x1xf32>
    %55 = arith.addf %51, %54 : vector<16x1xf32>
    %c0_30 = arith.constant 0 : index
    %c0_31 = arith.constant 0 : index
    %c0_32 = arith.constant 0 : index
    %56 = vector.load %arg10[%c0_30, %c0_31, %c0_32] : memref<1x16x1xf32, #tpu.memory_space<vmem>>, vector<1x16x1xf32>
    %57 = vector.shape_cast %56 : vector<1x16x1xf32> to vector<16x1xf32>
    %58 = vector.shape_cast %55 : vector<16x1xf32> to vector<1x16x1xf32>
    tpu.vector_store %arg10[%c0_30, %c0_31, %c0_32], %58 {strides = array<i32>} : memref<1x16x1xf32, #tpu.memory_space<vmem>>, vector<1x16x1xf32>,
    return
  }
  func.func @transform_0(%arg0: i32, %arg1: i32) -> (i32, i32) {
    %c1_i32 = arith.constant 1 : i32
    %0 = arith.muli %arg0, %c1_i32 : i32
    %1 = arith.addi %0, %arg1 : i32
    %c0_i32 = arith.constant 0 : i32
    %2 = arith.minsi %1, %c0_i32 : i32
    %c0_i32_0 = arith.constant 0 : i32
    %c0_i32_1 = arith.constant 0 : i32
    return %2, %c0_i32_0 : i32, i32
  }
  func.func @transform_1(%arg0: i32, %arg1: i32) -> (i32, i32) {
    %c1_i32 = arith.constant 1 : i32
    %0 = arith.muli %arg0, %c1_i32 : i32
    %1 = arith.addi %0, %arg1 : i32
    %c0_i32 = arith.constant 0 : i32
    %2 = arith.minsi %1, %c0_i32 : i32
    %c0_i32_0 = arith.constant 0 : i32
    %c0_i32_1 = arith.constant 0 : i32
    return %2, %c0_i32_0 : i32, i32
  }
  func.func @transform_2(%arg0: i32, %arg1: i32) -> (i32, i32) {
    %c1_i32 = arith.constant 1 : i32
    %0 = arith.muli %arg0, %c1_i32 : i32
    %1 = arith.addi %0, %arg1 : i32
    %c0_i32 = arith.constant 0 : i32
    %2 = arith.minsi %1, %c0_i32 : i32
    %c0_i32_0 = arith.constant 0 : i32
    %c0_i32_1 = arith.constant 0 : i32
    return %2, %c0_i32_0 : i32, i32
  }
  func.func @transform_3(%arg0: i32, %arg1: i32) -> (i32, i32) {
    %c1_i32 = arith.constant 1 : i32
    %0 = arith.muli %arg0, %c1_i32 : i32
    %1 = arith.addi %0, %arg1 : i32
    %c0_i32 = arith.constant 0 : i32
    %2 = arith.minsi %1, %c0_i32 : i32
    %c0_i32_0 = arith.constant 0 : i32
    %c0_i32_1 = arith.constant 0 : i32
    return %2, %c0_i32_0 : i32, i32
  }
  func.func @transform_4(%arg0: i32, %arg1: i32) -> (i32, i32) {
    %c1_i32 = arith.constant 1 : i32
    %0 = arith.muli %arg0, %c1_i32 : i32
    %1 = arith.addi %0, %arg1 : i32
    %c0_i32 = arith.constant 0 : i32
    %2 = arith.minsi %1, %c0_i32 : i32
    %c0_i32_0 = arith.constant 0 : i32
    %c0_i32_1 = arith.constant 0 : i32
    return %2, %c0_i32_0 : i32, i32
  }
  func.func @transform_5(%arg0: i32, %arg1: i32) -> (i32, i32) {
    %c1_i32 = arith.constant 1 : i32
    %0 = arith.muli %arg0, %c1_i32 : i32
    %1 = arith.addi %0, %arg1 : i32
    %c0_i32 = arith.constant 0 : i32
    %2 = arith.minsi %1, %c0_i32 : i32
    %c0_i32_0 = arith.constant 0 : i32
    %c0_i32_1 = arith.constant 0 : i32
    return %2, %c0_i32_0 : i32, i32
  }
  func.func @transform_6(%arg0: i32, %arg1: i32) -> (i32, i32) {
    %c1_i32 = arith.constant 1 : i32
    %0 = arith.muli %arg0, %c1_i32 : i32
    %1 = arith.addi %0, %arg1 : i32
    %c0_i32 = arith.constant 0 : i32
    %2 = arith.minsi %1, %c0_i32 : i32
    %c0_i32_0 = arith.constant 0 : i32
    %c0_i32_1 = arith.constant 0 : i32
    return %2, %c0_i32_0 : i32, i32
  }
  func.func @transform_7(%arg0: i32, %arg1: i32) -> (i32, i32, i32) {
    %c0_i32 = arith.constant 0 : i32
    %c0_i32_0 = arith.constant 0 : i32
    %c0_i32_1 = arith.constant 0 : i32
    return %arg0, %c0_i32, %c0_i32_0 : i32, i32, i32
  }
  func.func @transform_8(%arg0: i32, %arg1: i32) -> (i32, i32, i32) {
    %c0_i32 = arith.constant 0 : i32
    %c0_i32_0 = arith.constant 0 : i32
    %c0_i32_1 = arith.constant 0 : i32
    return %arg0, %c0_i32, %c0_i32_0 : i32, i32, i32
  }
}

</mosaic_0001>

<bundles_post_ra>
// kernel: tpu_custom_call.1
= control target key start
LH: loop header
LB: loop body
LE: loop exit
PB: predicated region body
PF: predicated region fallthrough
CT: control target
= control target key end

     0   :  { %14 = vsyncpa [#allocation3], 0  ;;  %s632_s0 = inlined_call_operand.vmem [shape: f32[16,64], index: 0, kind: input, shape index: {}]   ;;  %s633_s1 = inlined_call_operand.hbm [shape: f32[16,32], index: 1, kind: input, shape index: {}]   ;;  %s634_s2 = inlined_call_operand.vmem [shape: f32[16,2], index: 2, kind: input, shape index: {}]   ;;  %s635_s3 = inlined_call_operand.hbm [shape: f32[16,32], index: 3, kind: input, shape index: {}]   ;;  %s636_s4 = inlined_call_operand.hbm [shape: f32[16,32], index: 4, kind: input, shape index: {}]   ;;  %s637_s5 = inlined_call_operand.hbm [shape: f32[16,32], index: 5, kind: input, shape index: {}]   ;;  %s638_s6 = inlined_call_operand.hbm [shape: f32[16,32], index: 6, kind: input, shape index: {}]   ;;  %s639_s7 = inlined_call_operand.vmem [shape: f32[1,16,1], index: 7, kind: output, shape index: {0}]   ;;  %s640_s8 = inlined_call_operand.vmem [shape: f32[1,16,1], index: 8, kind: output, shape index: {1}]  }
   0x1   :  { %15 = vsyncpa [#allocation5], 0 }
   0x2   :  { %16 = vsyncpa [#allocation8], 0  ;;  %s74_s29 = sshll.u32 %s635_s3, 4  ;;  %s503_s30 = smov [#allocation4]   ;;  %s75_s29 = int_to_ptr.hbm [resolvable:$true] %s74_s29 }
   0x3   :  { %s76_s9 = sshll.u32 %s503_s30, 4  ;;  %s112_s12 = sshll.u32 %s637_s5, 4  ;;  %s77_s9 = int_to_ptr.vmem [resolvable:$true] %s76_s9  ;;  %s113_s12 = int_to_ptr.hbm [resolvable:$true] %s112_s12 }
   0x4   :  { %s504_s13 = smov 128   ;;  %s505_s14 = smov 8  }
   0x5   :  { %82 = dma.hbm_to_vmem [thread:$0]  %s75_s29, 256, %s77_s9, [#allocation5], %s504_s13, %s504_s13, %s505_s14  }
   0x6   :  { %s506_s15 = smov [#allocation7]   ;;  %s41_s19 = sshll.u32 %s633_s1, 4  ;;  %s42_s19 = int_to_ptr.hbm [resolvable:$true] %s41_s19 }
   0x7   :  { %s114_s16 = sshll.u32 %s506_s15, 4  ;;  %s93_s21 = sshll.u32 %s636_s4, 4  ;;  %s115_s16 = int_to_ptr.vmem [resolvable:$true] %s114_s16  ;;  %s94_s21 = int_to_ptr.hbm [resolvable:$true] %s93_s21 }
   0x8   :  { %120 = dma.hbm_to_vmem [thread:$0]  %s113_s12, 256, %s115_s16, [#allocation8], %s504_s13, %s504_s13, %s505_s14  }
   0x9   :  { %s507_s22 = smov [#allocation2]   ;;  %s508_s5 = smov [#allocation6]  }
   0xa   :  { %s43_s23 = sshll.u32 %s507_s22, 4  ;;  %s95_s24 = sshll.u32 %s508_s5, 4  ;;  %s44_s23 = int_to_ptr.vmem [resolvable:$true] %s43_s23  ;;  %s96_s24 = int_to_ptr.vmem [resolvable:$true] %s95_s24 }
   0xb   :  { %49 = dma.hbm_to_vmem [thread:$0]  %s42_s19, 256, %s44_s23, [#allocation3], %s504_s13, %s504_s13, %s505_s14  }
   0xc   :  { %s131_s27 = sshll.u32 %s638_s6, 4  ;;  %s509_s1 = smov [#allocation9]   ;;  %s132_s27 = int_to_ptr.hbm [resolvable:$true] %s131_s27 }
   0xd   :  { %101 = dma.hbm_to_vmem [thread:$0]  %s94_s21, 256, %s96_s24, [#allocation5], %s504_s13, %s504_s13, %s505_s14  }
   0xe   :  { %s133_s28 = sshll.u32 %s509_s1, 4  ;;  %s134_s28 = int_to_ptr.vmem [resolvable:$true] %s133_s28 }
   0xf   :  { %139 = dma.hbm_to_vmem [thread:$0]  %s132_s27, 256, %s134_s28, [#allocation8], %s504_s13, %s504_s13, %s505_s14  }
  0x10   :  { %497 = dma.done.wait [#allocation3], 256  }
  0x11   :  { %498 = vsyncadd [#allocation3], 4294967040 }
  0x12   :  { %499 = dma.done.wait [#allocation5], 512  }
  0x13   :  { %500 = vsyncadd [#allocation5], 4294966784 }
  0x14   :  { %501 = dma.done.wait [#allocation8], 512  }
  0x15   :  { %502 = vsyncadd [#allocation8], 4294966784  ;;  %v244_v0 = vld [vmem:[#allocation6] sm:$0xff]  ;;  %v248_v2 = vld [vmem:[#allocation4] sm:$0xff]  ;;  %vm237_vm0 = vcmask 261120   ;;  %vm224_vm1 = vcmask 7168  }
  0x16   :  { %v246_v1 = vld [vmem:[#allocation9] sm:$0xff]  ;;  %v245_v5 = vld [vmem:[#allocation6 + $0x8] sm:$0xff]  ;;  %v250_v7 = vld [vmem:[#allocation7] sm:$0xff]  ;;  %v510_v48 = vmov 0.0   ;;  %s511_s21 = smov 127  }
  0x17   :  { %v258_v3 = vsub.f32 %v244_v0, %v246_v1  ;;  %v268_v4 = vsub.f32 0.0, %v246_v1  ;;  %v247_v6 = vld [vmem:[#allocation9 + $0x8] sm:$0xff]  ;;  %v254_v8 = vadd.f32 -1.0, %v246_v1  ;;  %v249_v9 = vld [vmem:[#allocation4 + $0x8] sm:$0xff]  ;;  %v229_v12 = vld [vmem:[%s632_s0] sm:$0xff]  ;;  %v252_v21 = vsub.f32 %v248_v2, %v250_v7  ;;  %225 = vst.msk [vmem:[%s639_s7] sm:$0xff] %vm224_vm1, %v510_v48 }
  0x18   :  { %v259_v10 = vsub.f32 %v245_v5, %v247_v6  ;;  %v269_v11 = vsub.f32 0.0, %v247_v6  ;;  %v251_v15 = vld [vmem:[#allocation7 + $0x8] sm:$0xff]  ;;  %v231_v16 = vld [vmem:[#allocation2] sm:$0xff]  ;;  %v230_v19 = vld [vmem:[%s632_s0 + $0x8] sm:$0xff]  ;;  %v255_v23 = vadd.f32 -1.0, %v247_v6  ;;  %226 = vst.msk [vmem:[%s639_s7 + $0x8] sm:$0xff] %vm224_vm1, %v510_v48 }
  0x19   :  { %v260_v13 = vmul.f32 1.442695, %v258_v3  ;;  %v270_v14 = vmul.f32 1.442695, %v268_v4  ;;  %v232_v20 = vld [vmem:[#allocation2 + $0x8] sm:$0xff]  ;;  %v233_v22 = vsub.f32 %v229_v12, %v231_v16  ;;  %v253_v24 = vsub.f32 %v249_v9, %v251_v15  ;;  %227 = vst.msk [vmem:[%s640_s8] sm:$0xff] %vm224_vm1, %v510_v48 }
  0x1a   :  { %v262_v17 = vmul.f32 1.442695, %v259_v10  ;;  %v272_v18 = vmul.f32 1.442695, %v269_v11  ;;  %v234_v26 = vsub.f32 %v230_v19, %v232_v20  ;;  %v256_v27 = vsub.f32 %v254_v8, %v244_v0  ;;  %228 = vst.msk [vmem:[%s640_s8 + $0x8] sm:$0xff] %vm224_vm1, %v510_v48  ;;  %v286_v49 = vld [vmem:[%s634_s2] sm:$0xff] }
  0x1b   :  { %369 = vpow2.f32 %v260_v13  ;;  %v235_v25 = vmul.f32 %v233_v22, %v233_v22  ;;  %v266_v28 = vmul.f32 %v252_v21, %v252_v21  ;;  %v257_v30 = vsub.f32 %v255_v23, %v245_v5  ;;  %v287_v56 = vld [vmem:[%s634_s2 + $0x8] sm:$0xff] }
  0x1c   :  { %371 = vpow2.f32 %v270_v14  ;;  %v267_v32 = vmul.f32 %v253_v24, %v253_v24  ;;  %v236_v33 = vmul.f32 %v234_v26, %v234_v26 }
  0x1d   :  { %373 = vpow2.f32 %v262_v17  ;;  %v238_v29 = vsel %vm237_vm0, %v235_v25, 0.0 }
  0x1e   :  { %375 = vpow2.f32 %v272_v18  ;;  %239 = vadd.xlane.f32.xlu1 %v238_v29  ;;  %v241_v42 = vsel %vm237_vm0, %v236_v33, 0.0  ;;  %v298_v51 = vld [vmem:[%s639_s7] sm:$0xff] }
  0x1f   :  { %v299_v60 = vld [vmem:[%s639_s7 + $0x8] sm:$0xff] }
  0x20   :  { %v309_v63 = vld [vmem:[%s640_s8] sm:$0xff] }
  0x21   :  { %v370_v31 = vpop.eup %369  ;;  %v310_v2 = vld [vmem:[%s640_s8 + $0x8] sm:$0xff] }
  0x22   :  { %v372_v34 = vpop.eup %371  ;;  %v264_v35 = vadd.f32 %v370_v31, %v256_v27 }
  0x23   :  { %v374_v36 = vpop.eup %373  ;;  %v274_v37 = vmul.f32 %v372_v34, %v266_v28 }
  0x24   :  { %v376_v38 = vpop.eup %375  ;;  %v265_v39 = vadd.f32 %v374_v36, %v257_v30 }
  0x25   :  { %v276_v40 = vadd.f32 %v274_v37, %v264_v35  ;;  %v275_v41 = vmul.f32 %v376_v38, %v267_v32 }
  0x26   :  { %242 = vadd.xlane.f32.xlu1 %v241_v42 }
  0x27   :  { %v278_v43 = vmul.f32 0.5, %v276_v40  ;;  %v277_v44 = vadd.f32 %v275_v41, %v265_v39 }
  0x29   :  { %v280_v45 = vsel %vm237_vm0, %v278_v43, 0.0  ;;  %v279_v46 = vmul.f32 0.5, %v277_v44 }
  0x2a   :  { %281 = vadd.xlane.f32.xlu0 %v280_v45 }
  0x2b   :  { %v283_v47 = vsel %vm237_vm0, %v279_v46, 0.0 }
  0x32   :  { %284 = vadd.xlane.f32.xlu0 %v283_v47 }
  0x91   :  { %v240_v50 = vpop.xlane.xlu1 %239 }
  0x92   :  { %v300_v52 = vmul.f32 %v286_v49, %v240_v50 }
  0x94   :  { %v304_v53 = vadd.f32 %v300_v52, %v298_v51 }
  0x96   :  { %307 = vst.msk [vmem:[%s639_s7] sm:$0xff] %vm224_vm1, %v304_v53 }
  0x99   :  { %v243_v59 = vpop.xlane.xlu1 %242 }
  0x9a   :  { %v301_v61 = vmul.f32 %v287_v56, %v243_v59 }
  0x9c   :  { %v305_v62 = vadd.f32 %v301_v61, %v299_v60 }
  0x9d   :  { %v282_v54 = vpop.xlane.xlu0 %281 }
  0x9e   :  { %v311_v55 = vmul.f32 %v286_v49, %v282_v54  ;;  %308 = vst.msk [vmem:[%s639_s7 + $0x8] sm:$0xff] %vm224_vm1, %v305_v62 }
  0xa0   :  { %317 = vrot.lane.b32.xlu2 %v311_v55, %s511_s21 }
  0xa5   :  { %v285_v57 = vpop.xlane.xlu0 %284 }
  0xa6   :  { %v312_v58 = vmul.f32 %v287_v56, %v285_v57 }
  0xa8   :  { %319 = vrot.lane.b32.xlu2 %v312_v58, %s511_s21 }
  0xfa   :  { %v318_v0 = vpop.permute.xlu2 %317 }
  0xfb   :  { %v323_v1 = vadd.f32 %v318_v0, %v309_v63 }
  0xfd   :  { %325 = vst.msk [vmem:[%s640_s8] sm:$0xff] %vm224_vm1, %v323_v1 }
 0x102   :  { %v320_v3 = vpop.permute.xlu2 %319 }
 0x103   :  { %v324_v4 = vadd.f32 %v320_v3, %v310_v2 }
 0x105   :  { %326 = vst.msk [vmem:[%s640_s8 + $0x8] sm:$0xff] %vm224_vm1, %v324_v4 }
 0x106   :  { %335 = vsyncpa [#allocation3], 1 }
 0x107   :  { %336 = vsyncpa [#allocation5], 1 }
 0x108   :  { %337 = vsyncpa [#allocation8], 1 }

</bundles_post_ra>
